<compile_context>
chip_gen: v5e
topology: v5e:2x2
jax: 0.10.0
libtpu: 0.0.40
codegen_flags: <defaults>
</compile_context>

<pallas_src>
import jax
import jax.numpy as jnp
from jax.experimental import pallas as pl
from jax.experimental.pallas import tpu as pltpu


def _round_up(x, m):
    return ((x + m - 1) // m) * m


# ----------------------------------------------------------------------------
# Pallas kernel: whole forward hot path for one row-tile (2 matmuls total).
# ----------------------------------------------------------------------------
def ode_func_kernel(u_ref, agg_ref, wA_ref, bA_ref, wC_ref, bC_ref, out_ref):
    q = wA_ref.shape[1]                 # h feature width
    p = wC_ref.shape[0] - q             # c feature width
    wdt = wA_ref.dtype                  # MXU operand dtype (bf16 or f32)

    u = u_ref[...]                      # (TM, p+q) f32 == [c | h]
    c = u[:, :p]
    h = u[:, p:]
    agg = agg_ref[...]                  # (TM, q) — neighbor mean of h

    def softplus(x):
        # numerically stable softplus (matches torch.nn.Softplus / jax.nn.softplus)
        return jnp.maximum(x, 0.0) + jnp.log(1.0 + jnp.exp(-jnp.abs(x)))

    # --- A layer: ONE K=2q matmul on the lane-concatenated [h | agg] slab ---
    ha = jnp.concatenate([h, agg], axis=-1).astype(wdt)            # (TM, 2q)
    h_new = softplus(
        jnp.dot(ha, wA_ref[...], preferred_element_type=jnp.float32)
        + bA_ref[...])                                             # (TM, q)

    # --- fused heads [Fc | Fh | Gc | Z]: ONE K=(p+q) matmul, 128-lane output ---
    u_ = jnp.concatenate([c, h_new], axis=-1).astype(wdt)          # (TM, p+q)
    s = (jnp.dot(u_, wC_ref[...], preferred_element_type=jnp.float32)
         + bC_ref[...])                                            # (TM, 3p+q)

    # Full-width activation on the 128-lane slab: tanh on the trailing Z block,
    # softplus elsewhere, lane-selected via iota (EUP at full lane occupancy).
    col = jax.lax.broadcasted_iota(jnp.int32, s.shape, dimension=1)
    act = jnp.where(col >= 2 * p + q, jnp.tanh(s), softplus(s))

    # [Fc|Fh] lanes line up with u=[c|h]: one 64-lane-wide VPU multiply.
    base = -act[:, : p + q] * u                                    # [-Fc*c | -Fh*h]
    gcz = act[:, p + q: 2 * p + q] * act[:, 2 * p + q:]            # Gc * Z
    dc = base[:, :p] + gcz
    dh = base[:, p:]

    # dc -= sum(dc*c)/sum(c*c) * c   (no epsilon — matches the PyTorch module;
    # a real row with c == 0 would NaN there too)
    num = jnp.sum(dc * c, axis=-1, keepdims=True)
    den = jnp.sum(c * c, axis=-1, keepdims=True)
    dc = dc - (num / den) * c

    # single fused lane-dense store of (dc | dh)
    out_ref[...] = jnp.concatenate([dc, dh], axis=-1).astype(out_ref.dtype)


# ----------------------------------------------------------------------------
# Weight fusion — do this ONCE, outside any ODE-integrator loop.
# Weights are stored as (in_features, out_features) == torch W.T.
# Head order on the output axis is [Fc | Fh | Gc | Z] so the softplus heads are
# lane-aligned with u = [c | h] and tanh occupies the last p lanes.
# matmul_dtype=jnp.bfloat16 -> single-pass MXU (f32 accumulation); pass
# jnp.float32 to reproduce the reference to ~1e-5.
# ----------------------------------------------------------------------------
def prepare_fused_params(params, p, q, matmul_dtype=jnp.bfloat16):
    WC = jnp.concatenate(
        [params["WFc"], params["WFh"], params["WGc"], params["WZ"]], axis=1)
    bC = jnp.concatenate(
        [params["bFc"], params["bFh"], params["bGc"], params["bZ"]], axis=1)
    return {
        "WA": params["WA"].astype(matmul_dtype),    # (2q, q)
        "bA": params["bA"].astype(jnp.float32),     # (1, q)
        "WC": WC.astype(matmul_dtype),              # (p+q, 3p+q)
        "bC": bC.astype(jnp.float32),               # (1, 3p+q)
    }


def _choose_row_tile(M, tile_m, min_tiles):
    tm = _round_up(max(int(tile_m), 8), 8)
    if tm >= M:
        tm = M                          # single full-extent tile, no OOB rows
    n_tiles = pl.cdiv(M, tm)
    # keep >= min_tiles grid steps so the "parallel" axis can use both
    # TensorCores on v7x (neutral on v5e/v6e), when M is large enough
    if n_tiles < min_tiles and M >= 8 * min_tiles:
        tm = _round_up(pl.cdiv(M, min_tiles), 8)
        n_tiles = pl.cdiv(M, tm)
    return tm, n_tiles


# ----------------------------------------------------------------------------
# Wrapper: graph aggregation glue + pallas_call. No padding: the ragged last
# row tile uses Pallas clamped reads / dropped OOB writes (rows independent).
# ----------------------------------------------------------------------------
def ode_func_forward(u, fused, norm_adj, p, q, tile_m=2048, min_row_tiles=2):
    B, N, D = u.shape
    assert D == p + q
    M = B * N

    # glue: neighbor mean aggregation (zeros row if a node has no neighbors)
    # TODO(synk): fold this einsum into the kernel (batch-aligned row tiles +
    # adj@h on the MXU) to remove the agg HBM round trip; kept as XLA glue here
    # because row tiles must not straddle batch boundaries and rank-3 Mosaic
    # matmuls are fragile at tiny N.
    agg = jnp.einsum("nm,bmq->bnq", norm_adj, u[:, :, p:])

    u2 = u.reshape(M, D)                # free reshape; c/h sliced in-kernel
    agg2 = agg.reshape(M, q)

    tm, n_tiles = _choose_row_tile(M, tile_m, min_row_tiles)

    def row_spec(width):
        return pl.BlockSpec((tm, width), lambda i: (i, 0))

    def full_spec(arr):
        return pl.BlockSpec(arr.shape, lambda i: (0,) * arr.ndim)

    weights = [fused["WA"], fused["bA"], fused["WC"], fused["bC"]]

    out = pl.pallas_call(
        ode_func_kernel,
        out_shape=jax.ShapeDtypeStruct((M, D), jnp.float32),
        grid=(n_tiles,),
        in_specs=[row_spec(D), row_spec(q)] + [full_spec(w) for w in weights],
        out_specs=row_spec(D),
        compiler_params=pltpu.CompilerParams(
            dimension_semantics=("parallel",),  # rows independent -> both TCs on v7x
        ),
    )(u2, agg2, *weights)

    return out.reshape(B, N, D)


# ----------------------------------------------------------------------------
# Pure-JAX reference (mirrors the PyTorch forward exactly).
# ----------------------------------------------------------------------------
def ode_func_reference(u, params, norm_adj, p, q):
    c = u[..., :p]
    h = u[..., p:]
    agg = jnp.einsum("nm,bmq->bnq", norm_adj, h)
    sp = jax.nn.softplus
    hcat = jnp.concatenate([h, agg], axis=-1)
    h_ = sp(hcat @ params["WA"] + params["bA"][0])
    u_ = jnp.concatenate([c, h_], axis=-1)
    fc = sp(u_ @ params["WFc"] + params["bFc"][0])
    gc = sp(u_ @ params["WGc"] + params["bGc"][0])
    z = jnp.tanh(u_ @ params["WZ"] + params["bZ"][0])
    fh = sp(u_ @ params["WFh"] + params["bFh"][0])
    dc = -fc * c + gc * z
    dh = -fh * h
    dc = dc - jnp.sum(dc * c, -1, keepdims=True) / jnp.sum(
        c * c, -1, keepdims=True
    ) * c
    return jnp.concatenate([dc, dh], axis=-1)


# ----------------------------------------------------------------------------
# Deterministic parameter init (nn.init.normal_(std=0.1), bias = 0).
# ----------------------------------------------------------------------------
def init_params(key, p, q):
    names_shapes = [
        ("WA", (2 * q, q)),
        ("WFc", (p + q, p)),
        ("WGc", (p + q, p)),
        ("WZ", (p + q, p)),
        ("WFh", (p + q, q)),
    ]
    params = {}
    keys = jax.random.split(key, len(names_shapes))
    for k, (name, shape) in zip(keys, names_shapes):
        params[name] = 0.1 * jax.random.normal(k, shape, dtype=jnp.float32)
        params["b" + name[1:]] = jnp.zeros((1, shape[1]), dtype=jnp.float32)
    return params


# TODO(synk): simulate_jump / next_jump / read_jump are host-side event-record
# bookkeeping (bisect over a Python list) with no tensor hot path; not ported.

if __name__ == "__main__":
    import numpy as np

    # Accurate f32 matmuls for BOTH the reference and the in-kernel f32 path so
    # the strict 1e-5 comparison is meaningful. The bf16 kernel path is
    # unaffected (native single-pass MXU).
    jax.config.update("jax_default_matmul_precision", "highest")

    p, q = 32, 32  # latent dims of ODEFunc

    def ring_norm_adj(n_nodes):
        adj = np.zeros((n_nodes, n_nodes), dtype=np.float32)
        for n in range(n_nodes):
            adj[n, (n - 1) % n_nodes] = 1.0
            adj[n, (n + 1) % n_nodes] = 1.0
        deg = adj.sum(axis=1, keepdims=True)
        return jnp.asarray(np.where(deg > 0, adj / np.maximum(deg, 1.0), 0.0))

    key = jax.random.PRNGKey(0)
    kp, ku1, ku2, ku3 = jax.random.split(key, 4)
    params = init_params(kp, p, q)
    fused_f32 = prepare_fused_params(params, p, q, matmul_dtype=jnp.float32)
    fused_bf16 = prepare_fused_params(params, p, q)      # bf16 MXU operands

    cases = [
        (2, 4, ku1, None),   # M=8  : single full row tile
        (3, 5, ku2, None),   # M=15 : single full-extent (non-multiple-of-8) tile
        (4, 5, ku3, 8),      # M=20 : 3 row tiles, ragged (masked) last tile
    ]
    for B, N, k, tile_m in cases:
        u = jax.random.normal(k, (B, N, p + q), dtype=jnp.float32)
        adj = ring_norm_adj(N)
        ref = ode_func_reference(u, params, adj, p, q)
        kw = {} if tile_m is None else {"tile_m": tile_m}

        # exact-precision path (f32 MXU operands): strict check
        out_f32 = jax.block_until_ready(
            ode_func_forward(u, fused_f32, adj, p, q, **kw))
        assert out_f32.shape == (B, N, p + q)
        assert jnp.allclose(out_f32, ref, rtol=1e-5, atol=1e-5), \
            f"f32 mismatch B={B} N={N}"

        # production path (bf16 MXU operands, f32 accumulation): loose check
        out_bf16 = jax.block_until_ready(
            ode_func_forward(u, fused_bf16, adj, p, q, **kw))
        err = float(jnp.max(jnp.abs(out_bf16 - ref)))
        assert err < 0.25, f"bf16 mismatch B={B} N={N} max_err={err}"

    print("KERNEL_OK")
</pallas_src>

<mosaic_0001>
module attributes {stable_mosaic.version = 11 : i64} {
  func.func @ode_func_kernel(%arg0: i32, %arg1: memref<8x64xf32, #tpu.memory_space<vmem>>, %arg2: memref<8x32xf32, #tpu.memory_space<vmem>>, %arg3: memref<64x32xf32, #tpu.memory_space<vmem>>, %arg4: memref<1x32xf32, #tpu.memory_space<vmem>>, %arg5: memref<64x128xf32, #tpu.memory_space<vmem>>, %arg6: memref<1x128xf32, #tpu.memory_space<vmem>>, %arg7: memref<8x64xf32, #tpu.memory_space<vmem>>) attributes {dimension_semantics = [#tpu.dimension_semantics<parallel>], iteration_bounds = array<i64: 1>, scalar_prefetch = 0 : i64, scratch_operands = 0 : i64, tpu.core_type = #tpu.core_type<tc>, window_params = [{transform_indices = @transform_0, window_bounds = array<i64: 8, 64>}, {transform_indices = @transform_1, window_bounds = array<i64: 8, 32>}, {pipeline_mode = #tpu.pipeline_mode<synchronous>, transform_indices = @transform_2, window_bounds = array<i64: 64, 32>}, {pipeline_mode = #tpu.pipeline_mode<synchronous>, transform_indices = @transform_3, window_bounds = array<i64: 1, 32>}, {pipeline_mode = #tpu.pipeline_mode<synchronous>, transform_indices = @transform_4, window_bounds = array<i64: 64, 128>}, {pipeline_mode = #tpu.pipeline_mode<synchronous>, transform_indices = @transform_5, window_bounds = array<i64: 1, 128>}, {transform_indices = @transform_6, window_bounds = array<i64: 8, 64>}]} {
    %c0 = arith.constant 0 : index
    %c0_0 = arith.constant 0 : index
    %0 = vector.load %arg1[%c0, %c0_0] : memref<8x64xf32, #tpu.memory_space<vmem>>, vector<8x64xf32>
    %1 = vector.extract_strided_slice %0 {offsets = [0, 0], sizes = [8, 32], strides = [1, 1]} : vector<8x64xf32> to vector<8x32xf32>
    %2 = vector.extract_strided_slice %0 {offsets = [0, 32], sizes = [8, 32], strides = [1, 1]} : vector<8x64xf32> to vector<8x32xf32>
    %c0_1 = arith.constant 0 : index
    %c0_2 = arith.constant 0 : index
    %3 = vector.load %arg2[%c0_1, %c0_2] : memref<8x32xf32, #tpu.memory_space<vmem>>, vector<8x32xf32>
    %4 = tpu.concatenate %2, %3 in 1 : vector<8x32xf32>, vector<8x32xf32> -> vector<8x64xf32>
    %c0_3 = arith.constant 0 : index
    %c0_4 = arith.constant 0 : index
    %5 = vector.load %arg3[%c0_3, %c0_4] : memref<64x32xf32, #tpu.memory_space<vmem>>, vector<64x32xf32>
    %cst = arith.constant dense<0.000000e+00> : vector<8x32xf32>
    %6 = tpu.matmul %4, %5, %cst {dimension_numbers = #tpu.dot_dimension_numbers<[1], [0], [0], [1], [0, 0, 1, 1], [], []>, precision = #tpu.contract_precision<fp32>} : vector<8x64xf32>, vector<64x32xf32>, vector<8x32xf32> -> vector<8x32xf32>
    %c0_5 = arith.constant 0 : index
    %c0_6 = arith.constant 0 : index
    %7 = vector.load %arg4[%c0_5, %c0_6] : memref<1x32xf32, #tpu.memory_space<vmem>>, vector<1x32xf32>
    %8 = vector.broadcast %7 : vector<1x32xf32> to vector<8x32xf32>
    %9 = arith.addf %6, %8 : vector<8x32xf32>
    %cst_7 = arith.constant 0.000000e+00 : f32
    %10 = vector.broadcast %cst_7 : f32 to vector<8x32xf32>
    %11 = arith.maximumf %9, %10 : vector<8x32xf32>
    %12 = math.absf %9 : vector<8x32xf32>
    %cst_8 = arith.constant 0.000000e+00 : f32
    %13 = vector.broadcast %cst_8 : f32 to vector<8x32xf32>
    %14 = arith.subf %13, %12 : vector<8x32xf32>
    %15 = math.exp %14 : vector<8x32xf32>
    %cst_9 = arith.constant 1.000000e+00 : f32
    %16 = vector.broadcast %cst_9 : f32 to vector<8x32xf32>
    %17 = arith.addf %16, %15 : vector<8x32xf32>
    %18 = math.log %17 : vector<8x32xf32>
    %19 = arith.addf %11, %18 : vector<8x32xf32>
    %20 = tpu.concatenate %1, %19 in 1 : vector<8x32xf32>, vector<8x32xf32> -> vector<8x64xf32>
    %c0_10 = arith.constant 0 : index
    %c0_11 = arith.constant 0 : index
    %21 = vector.load %arg5[%c0_10, %c0_11] : memref<64x128xf32, #tpu.memory_space<vmem>>, vector<64x128xf32>
    %cst_12 = arith.constant dense<0.000000e+00> : vector<8x128xf32>
    %22 = tpu.matmul %20, %21, %cst_12 {dimension_numbers = #tpu.dot_dimension_numbers<[1], [0], [0], [1], [0, 0, 1, 1], [], []>, precision = #tpu.contract_precision<fp32>} : vector<8x64xf32>, vector<64x128xf32>, vector<8x128xf32> -> vector<8x128xf32>
    %c0_13 = arith.constant 0 : index
    %c0_14 = arith.constant 0 : index
    %23 = vector.load %arg6[%c0_13, %c0_14] : memref<1x128xf32, #tpu.memory_space<vmem>>, vector<1x128xf32>
    %24 = vector.broadcast %23 : vector<1x128xf32> to vector<8x128xf32>
    %25 = arith.addf %22, %24 : vector<8x128xf32>
    %26 = tpu.iota {dimensions = array<i32: 1>} : vector<8x128xi32>
    %c96_i32 = arith.constant 96 : i32
    %27 = vector.broadcast %c96_i32 : i32 to vector<8x128xi32>
    %28 = arith.cmpi sge, %26, %27 : vector<8x128xi32>
    %29 = math.tanh %25 : vector<8x128xf32>
    %cst_15 = arith.constant 0.000000e+00 : f32
    %30 = vector.broadcast %cst_15 : f32 to vector<8x128xf32>
    %31 = arith.maximumf %25, %30 : vector<8x128xf32>
    %32 = math.absf %25 : vector<8x128xf32>
    %cst_16 = arith.constant 0.000000e+00 : f32
    %33 = vector.broadcast %cst_16 : f32 to vector<8x128xf32>
    %34 = arith.subf %33, %32 : vector<8x128xf32>
    %35 = math.exp %34 : vector<8x128xf32>
    %cst_17 = arith.constant 1.000000e+00 : f32
    %36 = vector.broadcast %cst_17 : f32 to vector<8x128xf32>
    %37 = arith.addf %36, %35 : vector<8x128xf32>
    %38 = math.log %37 : vector<8x128xf32>
    %39 = arith.addf %31, %38 : vector<8x128xf32>
    %40 = arith.select %28, %29, %39 : vector<8x128xi1>, vector<8x128xf32>
    %41 = vector.extract_strided_slice %40 {offsets = [0, 0], sizes = [8, 64], strides = [1, 1]} : vector<8x128xf32> to vector<8x64xf32>
    %cst_18 = arith.constant 0.000000e+00 : f32
    %42 = vector.broadcast %cst_18 : f32 to vector<8x64xf32>
    %43 = arith.subf %42, %41 : vector<8x64xf32>
    %44 = arith.mulf %43, %0 : vector<8x64xf32>
    %45 = vector.extract_strided_slice %40 {offsets = [0, 64], sizes = [8, 32], strides = [1, 1]} : vector<8x128xf32> to vector<8x32xf32>
    %46 = vector.extract_strided_slice %40 {offsets = [0, 96], sizes = [8, 32], strides = [1, 1]} : vector<8x128xf32> to vector<8x32xf32>
    %47 = arith.mulf %45, %46 : vector<8x32xf32>
    %48 = vector.extract_strided_slice %44 {offsets = [0, 0], sizes = [8, 32], strides = [1, 1]} : vector<8x64xf32> to vector<8x32xf32>
    %49 = arith.addf %48, %47 : vector<8x32xf32>
    %50 = vector.extract_strided_slice %44 {offsets = [0, 32], sizes = [8, 32], strides = [1, 1]} : vector<8x64xf32> to vector<8x32xf32>
    %51 = arith.mulf %49, %1 : vector<8x32xf32>
    %cst_19 = arith.constant dense<0.000000e+00> : vector<8xf32>
    %52 = vector.multi_reduction <add>, %51, %cst_19 [1] : vector<8x32xf32> to vector<8xf32>
    %53 = vector.shape_cast %52 : vector<8xf32> to vector<8x1xf32>
    %54 = arith.mulf %1, %1 : vector<8x32xf32>
    %cst_20 = arith.constant dense<0.000000e+00> : vector<8xf32>
    %55 = vector.multi_reduction <add>, %54, %cst_20 [1] : vector<8x32xf32> to vector<8xf32>
    %56 = vector.shape_cast %55 : vector<8xf32> to vector<8x1xf32>
    %57 = arith.divf %53, %56 : vector<8x1xf32>
    %58 = vector.broadcast %57 : vector<8x1xf32> to vector<8x32xf32>
    %59 = arith.mulf %58, %1 : vector<8x32xf32>
    %60 = arith.subf %49, %59 : vector<8x32xf32>
    %61 = tpu.concatenate %60, %50 in 1 : vector<8x32xf32>, vector<8x32xf32> -> vector<8x64xf32>
    %c0_21 = arith.constant 0 : index
    %c0_22 = arith.constant 0 : index
    %62 = vector.load %arg7[%c0_21, %c0_22] : memref<8x64xf32, #tpu.memory_space<vmem>>, vector<8x64xf32>
    tpu.vector_store %arg7[%c0_21, %c0_22], %61 {strides = array<i32>} : memref<8x64xf32, #tpu.memory_space<vmem>>, vector<8x64xf32>,
    return
  }
  func.func @transform_0(%arg0: i32) -> (i32, i32) {
    %c0_i32 = arith.constant 0 : i32
    %c0_i32_0 = arith.constant 0 : i32
    return %arg0, %c0_i32 : i32, i32
  }
  func.func @transform_1(%arg0: i32) -> (i32, i32) {
    %c0_i32 = arith.constant 0 : i32
    %c0_i32_0 = arith.constant 0 : i32
    return %arg0, %c0_i32 : i32, i32
  }
  func.func @transform_2(%arg0: i32) -> (i32, i32) {
    %c0_i32 = arith.constant 0 : i32
    %c0_i32_0 = arith.constant 0 : i32
    %c0_i32_1 = arith.constant 0 : i32
    return %c0_i32, %c0_i32_0 : i32, i32
  }
  func.func @transform_3(%arg0: i32) -> (i32, i32) {
    %c0_i32 = arith.constant 0 : i32
    %c0_i32_0 = arith.constant 0 : i32
    %c0_i32_1 = arith.constant 0 : i32
    return %c0_i32, %c0_i32_0 : i32, i32
  }
  func.func @transform_4(%arg0: i32) -> (i32, i32) {
    %c0_i32 = arith.constant 0 : i32
    %c0_i32_0 = arith.constant 0 : i32
    %c0_i32_1 = arith.constant 0 : i32
    return %c0_i32, %c0_i32_0 : i32, i32
  }
  func.func @transform_5(%arg0: i32) -> (i32, i32) {
    %c0_i32 = arith.constant 0 : i32
    %c0_i32_0 = arith.constant 0 : i32
    %c0_i32_1 = arith.constant 0 : i32
    return %c0_i32, %c0_i32_0 : i32, i32
  }
  func.func @transform_6(%arg0: i32) -> (i32, i32) {
    %c0_i32 = arith.constant 0 : i32
    %c0_i32_0 = arith.constant 0 : i32
    return %arg0, %c0_i32 : i32, i32
  }
}

</mosaic_0001>

<bundles_post_ra>
// kernel: tpu_custom_call.1
= control target key start
LH: loop header
LB: loop body
LE: loop exit
PB: predicated region body
PF: predicated region fallthrough
CT: control target
= control target key end

     0   :  { %s668_s25 = smov 96   ;;  %s935_s0 = inlined_call_operand.vmem [shape: f32[8,64], index: 0, kind: input, shape index: {}]   ;;  %s936_s1 = inlined_call_operand.vmem [shape: f32[8,32], index: 1, kind: input, shape index: {}]   ;;  %s937_s2 = inlined_call_operand.vmem [shape: f32[64,32], index: 2, kind: input, shape index: {}]   ;;  %s938_s3 = inlined_call_operand.vmem [shape: f32[1,32], index: 3, kind: input, shape index: {}]   ;;  %s939_s4 = inlined_call_operand.vmem [shape: f32[64,128], index: 4, kind: input, shape index: {}]   ;;  %s940_s5 = inlined_call_operand.vmem [shape: f32[1,128], index: 5, kind: input, shape index: {}]   ;;  %s941_s6 = inlined_call_operand.hbm [shape: f32[8,64], index: 6, kind: output, shape index: {}]  }
   0x1   :  { %v710_v0 = vld [vmem:[%s935_s0] sm:$0xff]  ;;  %v43_v1 = vld [vmem:[%s937_s2 + $0x38] sm:$0xff]  ;;  %v42_v3 = vld [vmem:[%s937_s2 + $0x30] sm:$0xff] }
   0x2   :  { %27 = vrot.lane.b32.xlu0 %v710_v0, %s668_s25  ;;  %v717_v2 = vand.u32 4294901760, %v43_v1  ;;  %v41_v4 = vld [vmem:[%s937_s2 + $0x28] sm:$0xff]  ;;  %v40_v5 = vld [vmem:[%s937_s2 + $0x20] sm:$0xff]  ;;  %v728_v6 = vand.u32 4294901760, %v42_v3  ;;  %v39_v9 = vld [vmem:[%s937_s2 + $0x18] sm:$0xff] }
   0x3   :  { %v730_v7 = vand.u32 4294901760, %v41_v4  ;;  %v732_v8 = vand.u32 4294901760, %v40_v5  ;;  %v741_v11 = vand.u32 4294901760, %v39_v9 }
   0x4   :  { %v738_v10 = vsub.f32 %v43_v1, %v717_v2  ;;  %61 = vmatpush.msra.mxu0 %v717_v2  ;;  %193 = vmatpush.msra.mxu3 %v717_v2 }
   0x5   :  { %11 = vsyncpa [#allocation3], 0  ;;  %v745_v12 = vsub.f32 %v42_v3, %v728_v6  ;;  %v748_v13 = vsub.f32 %v41_v4, %v730_v7  ;;  %v751_v14 = vsub.f32 %v40_v5, %v732_v8  ;;  %v755_v16 = vsub.f32 %v39_v9, %v741_v11  ;;  %v25_v17 = vld [vmem:[%s936_s1] sm:$0xff]  ;;  %s669_s1 = smov 32   ;;  %v38_v32 = vld [vmem:[%s937_s2 + $0x10] sm:$0xff]  ;;  %s615_s12 = sshll.u32 %s941_s6, 4  ;;  %s616_s12 = int_to_ptr.hbm [resolvable:$true] %s615_s12 }
   0x6   :  { %v95_v15 = vand.u32 4294901760, %v738_v10  ;;  %156 = vmatpush.msra.mxu2 %v738_v10  ;;  %63 = vmatpush.msra.mxu0 %v728_v6  ;;  %v70_v33 = vand.u32 4294901760, %v38_v32  ;;  %v37_v34 = vld [vmem:[%s937_s2 + $0x8] sm:$0xff]  ;;  %v36_v37 = vld [vmem:[%s937_s2] sm:$0xff]  ;;  %vm34_vm0 = vcmask 261120   ;;  %vm48_vm1 = vcmask 523264  }
   0x7   :  { %v101_v18 = vand.u32 4294901760, %v745_v12  ;;  %v107_v19 = vand.u32 4294901760, %v748_v13  ;;  %v113_v20 = vand.u32 4294901760, %v751_v14  ;;  %195 = vmatpush.msra.mxu3 %v728_v6  ;;  %v119_v22 = vand.u32 4294901760, %v755_v16  ;;  %v628_v59 = vld [vmem:[%s938_s3] ss:$0 sm:$0xff] }
   0x8   :  { %v96_v21 = vsub.f32 %v738_v10, %v95_v15  ;;  %159 = vmatpush.msra.mxu2 %v745_v12  ;;  %65 = vmatpush.msra.mxu0 %v730_v7  ;;  %v124_v35 = vsub.f32 %v38_v32, %v70_v33  ;;  %v72_v36 = vand.u32 4294901760, %v37_v34  ;;  %v74_v40 = vand.u32 4294901760, %v36_v37  ;;  %v310_v5 = vld [vmem:[%s939_s4 + $0x38] sm:$0xff] }
   0x9   :  { %v102_v23 = vsub.f32 %v745_v12, %v101_v18  ;;  %v108_v24 = vsub.f32 %v748_v13, %v107_v19  ;;  %197 = vmatpush.msra.mxu3 %v730_v7  ;;  %v114_v26 = vsub.f32 %v751_v14, %v113_v20  ;;  %v120_v29 = vsub.f32 %v755_v16, %v119_v22  ;;  %v307_v12 = vld [vmem:[%s939_s4 + $0x20] sm:$0xff] }
   0xa   :  { %31 = vrot.lane.b32.xlu0 %v25_v17, %s669_s1  ;;  %v97_v25 = vand.u32 4294901760, %v96_v21  ;;  %162 = vmatpush.msra.mxu2 %v748_v13  ;;  %v125_v38 = vand.u32 4294901760, %v124_v35  ;;  %v130_v39 = vsub.f32 %v37_v34, %v72_v36  ;;  %v136_v43 = vsub.f32 %v36_v37, %v74_v40  ;;  %v306_v13 = vld [vmem:[%s939_s4 + $0x18] sm:$0xff] }
   0xb   :  { %v103_v27 = vand.u32 4294901760, %v102_v23  ;;  %67 = vmatpush.msra.mxu0 %v732_v8  ;;  %199 = vmatpush.msra.mxu3 %v732_v8  ;;  %v109_v28 = vand.u32 4294901760, %v108_v24  ;;  %v115_v30 = vand.u32 4294901760, %v114_v26  ;;  %v121_v31 = vand.u32 4294901760, %v120_v29 }
   0xc   :  { %98 = vmatpush.msra.mxu1 %v97_v25  ;;  %165 = vmatpush.msra.mxu2 %v751_v14  ;;  %v126_v41 = vsub.f32 %v124_v35, %v125_v38  ;;  %v131_v42 = vand.u32 4294901760, %v130_v39  ;;  %v137_v46 = vand.u32 4294901760, %v136_v43  ;;  %v811_v9 = vand.u32 4294901760, %v310_v5  ;;  %v305_v14 = vld [vmem:[%s939_s4 + $0x10] sm:$0xff] }
   0xd   :  { %69 = vmatpush.msra.mxu0 %v741_v11  ;;  %201 = vmatpush.msra.mxu3 %v741_v11  ;;  %v828_v17 = vand.u32 4294901760, %v306_v13 }
   0xe   :  { %104 = vmatpush.msra.mxu1 %v103_v27  ;;  %168 = vmatpush.msra.mxu2 %v755_v16  ;;  %v127_v44 = vand.u32 4294901760, %v126_v41  ;;  %v132_v45 = vsub.f32 %v130_v39, %v131_v42  ;;  %v138_v48 = vsub.f32 %v136_v43, %v137_v46  ;;  %v826_v16 = vand.u32 4294901760, %v307_v12 }
   0xf   :  { %71 = vmatpush.msra.mxu0 %v70_v33  ;;  %203 = vmatpush.msra.mxu3 %v70_v33  ;;  %v836_v21 = vsub.f32 %v310_v5, %v811_v9  ;;  %v854_v27 = vsub.f32 %v306_v13, %v828_v17 }
  0x10   :  { %110 = vmatpush.msra.mxu1 %v109_v28  ;;  %171 = vmatpush.msra.mxu2 %v124_v35  ;;  %v133_v47 = vand.u32 4294901760, %v132_v45  ;;  %v139_v49 = vand.u32 4294901760, %v138_v48  ;;  %v851_v26 = vsub.f32 %v307_v12, %v826_v16 }
  0x11   :  { %73 = vmatpush.msra.mxu0 %v72_v36  ;;  %205 = vmatpush.msra.mxu3 %v72_v36  ;;  %v361_v28 = vand.u32 4294901760, %v836_v21 }
  0x12   :  { %116 = vmatpush.msra.mxu1 %v115_v30  ;;  %174 = vmatpush.msra.mxu2 %v130_v39 }
  0x13   :  { %75 = vmatpush.msra.mxu0 %v74_v40  ;;  %207 = vmatpush.msra.mxu3 %v74_v40  ;;  %v362_v35 = vsub.f32 %v836_v21, %v361_v28 }
  0x14   :  { %122 = vmatpush.msra.mxu1 %v121_v31  ;;  %177 = vmatpush.msra.mxu2 %v136_v43 }
  0x15   :  { %226 = vmatpush.msrb.mxu0 %v95_v15  ;;  %v363_v41 = vand.u32 4294901760, %v362_v35 }
  0x16   :  { %128 = vmatpush.msra.mxu1 %v127_v44  ;;  %327 = vmatpush.msrb.mxu2 %v811_v9 }
  0x17   :  { %230 = vmatpush.msrb.mxu0 %v101_v18  ;;  %v830_v18 = vand.u32 4294901760, %v305_v14  ;;  %364 = vmatpush.msrb.mxu3 %v363_v41 }
  0x18   :  { %134 = vmatpush.msra.mxu1 %v133_v47 }
  0x19   :  { %234 = vmatpush.msrb.mxu0 %v107_v19  ;;  %v304_v19 = vld [vmem:[%s939_s4 + $0x8] sm:$0xff]  ;;  %v862_v31 = vsub.f32 %v305_v14, %v830_v18 }
  0x1a   :  { %140 = vmatpush.msra.mxu1 %v139_v49  ;;  %v846_v24 = vand.u32 4294901760, %v304_v19 }
  0x1b   :  { %238 = vmatpush.msrb.mxu0 %v113_v20  ;;  %v391_v44 = vand.u32 4294901760, %v862_v31 }
  0x1c   :  { %269 = vmatpush.msrb.mxu1 %v717_v2  ;;  %v867_v34 = vsub.f32 %v304_v19, %v846_v24 }
  0x1d   :  { %242 = vmatpush.msrb.mxu0 %v119_v22 }
  0x1e   :  { %271 = vmatpush.msrb.mxu1 %v728_v6  ;;  %v309_v6 = vld [vmem:[%s939_s4 + $0x30] sm:$0xff]  ;;  %v397_v48 = vand.u32 4294901760, %v867_v34 }
  0x1f   :  { %246 = vmatpush.msrb.mxu0 %v125_v38  ;;  %v813_v10 = vand.u32 4294901760, %v309_v6  ;;  %v385_v38 = vand.u32 4294901760, %v854_v27 }
  0x20   :  { %273 = vmatpush.msrb.mxu1 %v730_v7  ;;  %v308_v7 = vld [vmem:[%s939_s4 + $0x28] sm:$0xff] }
  0x21   :  { %250 = vmatpush.msrb.mxu0 %v131_v42  ;;  %v839_v22 = vsub.f32 %v309_v6, %v813_v10  ;;  %329 = vmatpush.msrb.mxu2 %v813_v10  ;;  %v386_v47 = vsub.f32 %v854_v27, %v385_v38 }
  0x22   :  { %275 = vmatpush.msrb.mxu1 %v732_v8 }
  0x23   :  { %254 = vmatpush.msrb.mxu0 %v137_v46  ;;  %v367_v29 = vand.u32 4294901760, %v839_v22 }
  0x24   :  { %277 = vmatpush.msrb.mxu1 %v741_v11  ;;  %v815_v11 = vand.u32 4294901760, %v308_v7 }
  0x26   :  { %279 = vmatpush.msrb.mxu1 %v70_v33  ;;  %v842_v23 = vsub.f32 %v308_v7, %v815_v11  ;;  %v379_v33 = vand.u32 4294901760, %v851_v26  ;;  %331 = vmatpush.msrb.mxu2 %v815_v11 }
  0x28   :  { %281 = vmatpush.msrb.mxu1 %v72_v36  ;;  %v373_v30 = vand.u32 4294901760, %v842_v23  ;;  %v368_v36 = vsub.f32 %v839_v22, %v367_v29  ;;  %v380_v43 = vsub.f32 %v851_v26, %v379_v33  ;;  %333 = vmatpush.msrb.mxu2 %v826_v16 }
  0x2a   :  { %283 = vmatpush.msrb.mxu1 %v74_v40  ;;  %v374_v37 = vsub.f32 %v842_v23, %v373_v30  ;;  %v303_v40 = vld [vmem:[%s939_s4] sm:$0xff]  ;;  %v369_v42 = vand.u32 4294901760, %v368_v36  ;;  %335 = vmatpush.msrb.mxu2 %v828_v17 }
  0x2b   :  { %v340_v49 = vand.u32 4294901760, %v303_v40 }
  0x2c   :  { %v375_v46 = vand.u32 4294901760, %v374_v37  ;;  %370 = vmatpush.msrb.mxu3 %v369_v42  ;;  %337 = vmatpush.msrb.mxu2 %v830_v18 }
  0x2e   :  { %376 = vmatpush.msrb.mxu3 %v375_v46  ;;  %339 = vmatpush.msrb.mxu2 %v846_v24 }
  0x30   :  { %341 = vmatpush.msrb.mxu2 %v340_v49 }
  0x74   :  { %v28_v50 = vpop.permute.xlu0 %27 }
  0x7c   :  { %v32_v51 = vpop.permute.xlu0 %31 }
  0x7d   :  { %v35_v52 = vsel %vm34_vm0, %v28_v50, %v32_v51  ;;  %v381_v50 = vand.u32 4294901760, %v380_v43  ;;  %v392_v51 = vsub.f32 %v862_v31, %v391_v44 }
  0x7e   :  { %v50_v53 = vsel %vm48_vm1, %v35_v52, 0  ;;  %v402_v52 = vsub.f32 %v303_v40, %v340_v49 }
  0x7f   :  { %v76_v54 = vand.u32 4294901760, %v50_v53  ;;  %382 = vmatpush.msrb.mxu3 %v381_v50 }
  0x81   :  { %v77_v55 = vsub.f32 %v50_v53, %v76_v54  ;;  %142 = vmatmul.f32.vlgmr.msra.gmra.mxu1 %v76_v54  ;;  %v387_v53 = vand.u32 4294901760, %v386_v47 }
  0x82   :  { %459 = vmatpush.msra.mxu1 %v811_v9 }
  0x83   :  { %180 = vmatmul.f32.vlgmr.msra.gmra.mxu2 %v77_v55  ;;  %v78_v56 = vand.u32 4294901760, %v77_v55  ;;  %388 = vmatpush.msrb.mxu3 %v387_v53 }
  0x84   :  { %461 = vmatpush.msra.mxu1 %v813_v10  ;;  %492 = vmatpush.msra.mxu2 %v361_v28 }
  0x85   :  { %211 = vmatmul.f32.vlgmr.msra.gmra.mxu3 %v78_v56  ;;  %v79_v57 = vsub.f32 %v77_v55, %v78_v56  ;;  %v403_v55 = vand.u32 4294901760, %v402_v52  ;;  %v393_v56 = vand.u32 4294901760, %v392_v51 }
  0x86   :  { %463 = vmatpush.msra.mxu1 %v815_v11  ;;  %496 = vmatpush.msra.mxu2 %v367_v29  ;;  %v555_v29 = vlaneseq }
  0x87   :  { %v80_v58 = vand.u32 4294901760, %v79_v57  ;;  %v404_v57 = vsub.f32 %v402_v52, %v403_v55  ;;  %394 = vmatpush.msrb.mxu3 %v393_v56 }
  0x88   :  { %465 = vmatpush.msra.mxu1 %v826_v16  ;;  %500 = vmatpush.msra.mxu2 %v373_v30  ;;  %v556_v30 = vand.u32 127, %v555_v29 }
  0x89   :  { %81 = vmatmul.f32.vlgmr.msra.gmra.mxu0 %v80_v58  ;;  %285 = vmatmul.f32.vlgmr.msrb.gmra.mxu1 %v76_v54 }
  0x8a   :  { %422 = vmatpush.msra.mxu0 %v836_v21  ;;  %467 = vmatpush.msra.mxu1 %v828_v17  ;;  %vm557_vm2 = vcmp.ge.s32.totalorder %v556_v30, 96 }
  0x8b   :  { %504 = vmatpush.msra.mxu2 %v379_v33 }
  0x8c   :  { %425 = vmatpush.msra.mxu0 %v839_v22  ;;  %469 = vmatpush.msra.mxu1 %v830_v18 }
  0x8d   :  { %508 = vmatpush.msra.mxu2 %v385_v38 }
  0x8e   :  { %428 = vmatpush.msra.mxu0 %v842_v23  ;;  %471 = vmatpush.msra.mxu1 %v846_v24 }
  0x8f   :  { %512 = vmatpush.msra.mxu2 %v391_v44 }
  0x90   :  { %431 = vmatpush.msra.mxu0 %v851_v26  ;;  %473 = vmatpush.msra.mxu1 %v340_v49 }
  0x91   :  { %256 = vmatmul.f32.vlgmr.msrb.gmra.mxu0 %v76_v54  ;;  %v398_v54 = vsub.f32 %v867_v34, %v397_v48  ;;  %516 = vmatpush.msra.mxu2 %v397_v48 }
  0x92   :  { %434 = vmatpush.msra.mxu0 %v854_v27 }
  0x93   :  { %520 = vmatpush.msra.mxu2 %v403_v55 }
  0x94   :  { %437 = vmatpush.msra.mxu0 %v862_v31 }
  0x96   :  { %440 = vmatpush.msra.mxu0 %v867_v34 }
  0x98   :  { %443 = vmatpush.msra.mxu0 %v402_v52 }
  0xfe   :  { %v143_v60 = vpop.f32.mrf.mxu1 }
 0x106   :  { %v82_v61 = vpop.f32.mrf.mxu0  ;;  %v181_v1 = vpop.f32.mrf.mxu2 }
 0x107   :  { %v83_v62 = vadd.f32 %v628_v59, %v82_v61  ;;  %v286_v20 = vpop.f32.mrf.mxu1  ;;  %v405_v61 = vand.u32 4294901760, %v404_v57 }
 0x108   :  { %v212_v3 = vpop.f32.mrf.mxu3 }
 0x109   :  { %v144_v63 = vadd.f32 %v143_v60, %v83_v62  ;;  %v399_v60 = vand.u32 4294901760, %v398_v54 }
 0x10b   :  { %v182_v2 = vadd.f32 %v181_v1, %v144_v63  ;;  %400 = vmatpush.msrb.mxu3 %v399_v60 }
 0x10d   :  { %v213_v4 = vadd.f32 %v212_v3, %v182_v2  ;;  %406 = vmatpush.msrb.mxu3 %v405_v61 }
 0x10e   :  { %v257_v8 = vpop.f32.mrf.mxu0 }
 0x10f   :  { %v258_v15 = vadd.f32 %v257_v8, %v213_v4  ;;  %535 = vmatpush.msra.mxu3 %v811_v9 }
 0x111   :  { %v848_v25 = vadd.f32 %v286_v20, %v258_v15  ;;  %537 = vmatpush.msra.mxu3 %v813_v10 }
 0x113   :  { %v290_v32 = vand.u32 2147483647, %v848_v25  ;;  %v289_v63 = vmax.f32 %v848_v25, 0.0  ;;  %539 = vmatpush.msra.mxu3 %v815_v11  ;;  %v629_v11 = vld [vmem:[%s940_s5] ss:$0 sm:$0xff]  ;;  %s670_s5 = smov 64  }
 0x115   :  { %v291_v39 = vsub.f32 0.0, %v290_v32  ;;  %541 = vmatpush.msra.mxu3 %v826_v16 }
 0x117   :  { %v292_v45 = vmul.f32 1.442695, %v291_v39  ;;  %543 = vmatpush.msra.mxu3 %v828_v17  ;;  %v585_v39 = vmul.f32 %v710_v0, %v710_v0 }
 0x119   :  { %630 = vpow2.f32 %v292_v45  ;;  %545 = vmatpush.msra.mxu3 %v830_v18  ;;  %v586_v40 = vsel %vm34_vm0, %v585_v39, 0.0 }
 0x11b   :  { %547 = vmatpush.msra.mxu3 %v846_v24 }
 0x11d   :  { %549 = vmatpush.msra.mxu3 %v340_v49 }
 0x11f   :  { %v631_v58 = vpop.eup %630 }
 0x120   :  { %v294_v59 = vadd.f32 1.0, %v631_v58 }
 0x122   :  { %632 = vlog2.f32 %v294_v59 }
 0x128   :  { %v633_v62 = vpop.eup %632 }
 0x129   :  { %v296_v1 = vmul.f32 0.6931472, %v633_v62 }
 0x12b   :  { %v297_v2 = vadd.f32 %v296_v1, %v289_v63 }
 0x12d   :  { %299 = vrot.lane.b32.xlu1 %v297_v2, %s669_s1 }
 0x19f   :  { %v300_v3 = vpop.permute.xlu1 %299 }
 0x1a0   :  { %v302_v4 = vsel %vm34_vm0, %v710_v0, %v300_v3 }
 0x1a1   :  { %v316_v5 = vsel %vm48_vm1, %v302_v4, 0 }
 0x1a2   :  { %v342_v6 = vand.u32 4294901760, %v316_v5 }
 0x1a4   :  { %v343_v7 = vsub.f32 %v316_v5, %v342_v6  ;;  %408 = vmatmul.f32.vlgmr.msrb.gmra.mxu3 %v342_v6 }
 0x1a6   :  { %446 = vmatmul.f32.vlgmr.msra.gmra.mxu0 %v343_v7  ;;  %v344_v8 = vand.u32 4294901760, %v343_v7 }
 0x1a8   :  { %477 = vmatmul.f32.vlgmr.msra.gmra.mxu1 %v344_v8  ;;  %v345_v9 = vsub.f32 %v343_v7, %v344_v8 }
 0x1aa   :  { %v346_v10 = vand.u32 4294901760, %v345_v9 }
 0x1ac   :  { %347 = vmatmul.f32.vlgmr.msrb.gmra.mxu2 %v346_v10  ;;  %551 = vmatmul.f32.vlgmr.msra.gmra.mxu3 %v342_v6 }
 0x1b4   :  { %522 = vmatmul.f32.vlgmr.msra.gmra.mxu2 %v342_v6 }
 0x223   :  { %v447_v16 = vpop.f32.mrf.mxu0 }
 0x225   :  { %v478_v18 = vpop.f32.mrf.mxu1 }
 0x227   :  { %v409_v12 = vpop.f32.mrf.mxu3 }
 0x22f   :  { %v348_v13 = vpop.f32.mrf.mxu2  ;;  %v552_v22 = vpop.f32.mrf.mxu3 }
 0x230   :  { %v349_v14 = vadd.f32 %v629_v11, %v348_v13 }
 0x232   :  { %v410_v15 = vadd.f32 %v409_v12, %v349_v14 }
 0x234   :  { %v448_v17 = vadd.f32 %v447_v16, %v410_v15 }
 0x236   :  { %v479_v19 = vadd.f32 %v478_v18, %v448_v17 }
 0x237   :  { %v523_v20 = vpop.f32.mrf.mxu2 }
 0x238   :  { %v524_v21 = vadd.f32 %v523_v20, %v479_v19 }
 0x23a   :  { %v553_v23 = vadd.f32 %v552_v22, %v524_v21 }
 0x23c   :  { %v560_v24 = vand.u32 2147483647, %v553_v23  ;;  %v559_v32 = vmax.f32 %v553_v23, 0.0 }
 0x23e   :  { %v561_v25 = vsub.f32 0.0, %v560_v24 }
 0x240   :  { %v562_v26 = vmul.f32 1.442695, %v561_v25 }
 0x242   :  { %634 = vpow2.f32 %v562_v26 }
 0x248   :  { %v635_v27 = vpop.eup %634 }
 0x249   :  { %v564_v28 = vadd.f32 1.0, %v635_v27 }
 0x24b   :  { %636 = vlog2.f32 %v564_v28 }
 0x24c   :  { %638 = vtanh.f32 %v553_v23 }
 0x251   :  { %v637_v31 = vpop.eup %636 }
 0x252   :  { %v566_v33 = vmul.f32 0.6931472, %v637_v31  ;;  %v639_v35 = vpop.eup %638 }
 0x254   :  { %v567_v34 = vadd.f32 %v566_v33, %v559_v32 }
 0x256   :  { %v568_v36 = vsel %vm557_vm2, %v639_v35, %v567_v34 }
 0x257   :  { %572 = vrot.lane.b32.xlu1 %v568_v36, %s668_s25  ;;  %v569_v41 = vsub.f32 0.0, %v568_v36  ;;  %s671_s25 = smov [#allocation2]  }
 0x258   :  { %s613_s10 = sshll.u32 %s671_s25, 4  ;;  %s614_s10 = int_to_ptr.vmem [resolvable:$true] %s613_s10 }
 0x259   :  { %v570_v42 = vmul.f32 %v569_v41, %v710_v0 }
 0x2c9   :  { %v573_v37 = vpop.permute.xlu1 %572 }
 0x2ca   :  { %v575_v38 = vmul.f32 %v573_v37, %v568_v36 }
 0x2cc   :  { %577 = vrot.lane.b32.xlu2 %v575_v38, %s670_s5 }
 0x2f5   :  { %587 = vadd.xlane.f32.xlu2 %v586_v40 }
 0x326   :  { %v578_v43 = vpop.permute.xlu2 %577 }
 0x327   :  { %v580_v44 = vadd.f32 %v578_v43, %v570_v42 }
 0x329   :  { %v581_v45 = vmul.f32 %v580_v44, %v710_v0 }
 0x32b   :  { %v582_v46 = vsel %vm34_vm0, %v581_v45, 0.0 }
 0x32c   :  { %583 = vadd.xlane.f32.xlu0 %v582_v46 }
 0x368   :  { %v588_v47 = vpop.xlane.xlu2 %587 }
 0x369   :  { %640 = vrcp.f32 %v588_v47  ;;  %vm594_vm3 = vweird.f32 %v588_v47  ;;  %v600_v52 = vand.u32 2147483648, %v588_v47  ;;  %v598_v54 = vand.u32 2147483647, %v588_v47 }
 0x36b   :  { %v601_v55 = vor.u32 1.1754944e-38, %v600_v52  ;;  %vm599_vm6 = vcmp.eq.f32.partialorder %v598_v54, 8.507059e+37 }
 0x36f   :  { %v641_v48 = vpop.eup %640 }
 0x370   :  { %v590_v49 = vmul.f32 %v641_v48, %v588_v47  ;;  %vm595_vm4 = vweird.f32 %v641_v48 }
 0x371   :  { %vm596_vm5 = vmor %vm594_vm3, %vm595_vm4 }
 0x372   :  { %v591_v50 = vsub.f32 1.0, %v590_v49 }
 0x374   :  { %v592_v51 = vmul.f32 %v641_v48, %v591_v50 }
 0x376   :  { %v593_v53 = vadd.f32 %v641_v48, %v592_v51 }
 0x378   :  { %v597_v56 = vsel %vm596_vm5, %v641_v48, %v593_v53 }
 0x379   :  { %v602_v58 = vsel %vm599_vm6, %v601_v55, %v597_v56 }
 0x39f   :  { %v584_v57 = vpop.xlane.xlu0 %583 }
 0x3a0   :  { %v603_v59 = vmul.f32 %v602_v58, %v584_v57 }
 0x3a2   :  { %v604_v60 = vmul.f32 %v603_v59, %v710_v0 }
 0x3a4   :  { %v605_v61 = vsub.f32 %v580_v44, %v604_v60 }
 0x3a6   :  { %v606_v62 = vsel %vm34_vm0, %v605_v61, %v570_v42 }
 0x3a7   :  { %607 = vst.msk [vmem:[#allocation2] sm:$0xff] %vm48_vm1, %v606_v62 }
 0x3a8   :  { %618 = dma.vmem_to_hbm [thread:$0]  %s614_s10, 128, %s616_s12, [#allocation3]  }
 0x3a9   :  { %666 = dma.done.wait [#allocation3], 128  }
 0x3aa   :  { %667 = vsyncadd [#allocation3], 4294967168 }
 0x3ab   :  { %623 = vsyncpa [#allocation3], 1 }

</bundles_post_ra>
